<compile_context>
chip_gen: v5e
topology: v5e:2x2
jax: 0.10.0
libtpu: 0.0.40
codegen_flags: <defaults>
</compile_context>

<pallas_src>
import functools

import jax
import jax.numpy as jnp
from jax.experimental import pallas as pl
from jax.experimental.pallas import tpu as pltpu

SUBLANES = 8
LANES = 128


def _round_up(n, m):
    return ((n + m - 1) // m) * m


def _mlp_kernel(x_ref, w1_ref, b1_ref, w2_ref, b2_ref, o_ref):
    # x_ref: (2, 8, tl) VMEM block -- batch packed across sublanes + lanes.
    # w1/b1/w2/b2: flat 1-D f32 refs in SMEM (scalar reads).
    # o_ref: (8, tl) VMEM block (lane-dense output -> unmasked stores).
    x0 = x_ref[0]                                   # (8, tl) input feature 0
    x1 = x_ref[1]                                   # (8, tl) input feature 1

    # Hidden unit j=0 seeds the accumulator (no separate zero-init + add).
    h = w1_ref[0] * x0 + w1_ref[1] * x1 + b1_ref[0]
    h = jnp.where(h > 0, h, jnp.exp(h) - 1.0)       # ELU(alpha=1); select drops inf branch
    y = w2_ref[0] * h

    # Remaining 4 hidden units, fully unrolled: scalar-broadcast VPU FMAs plus
    # one EUP exp each.  No MXU involvement (2/5/1 features would waste it).
    for j in range(1, 5):
        h = w1_ref[2 * j] * x0 + w1_ref[2 * j + 1] * x1 + b1_ref[j]
        h = jnp.where(h > 0, h, jnp.exp(h) - 1.0)
        y = y + w2_ref[j] * h

    y = y + b2_ref[0]

    # sigmoid(y) = 0.5 * tanh(y/2) + 0.5  -- transcendental stays on the EUP
    # slot, exact to f32 (no approximate reciprocal).
    o_ref[...] = 0.5 * jnp.tanh(0.5 * y) + 0.5


def modelp_forward_slab(x_slab, w1, b1, w2, b2, *, max_tile_lanes=32768):
    """Zero-copy entry point.

    x_slab: (2, 8, L) float32, feature-major, L a multiple of 128.
    Returns the (8, L) output slab (batch element b lives at (b // L, b % L)).
    """
    two, sub, L = x_slab.shape
    assert two == 2 and sub == SUBLANES and L % LANES == 0

    # Lane tile: force a multiple of 128, cap at L. Default 32768 lanes ->
    # x block 2 MiB + out block 1 MiB, double-buffered ~6 MiB: fits v5e's
    # 16 MiB scoped-VMEM default, so no vmem_limit_bytes override needed.
    tl = min(max_tile_lanes, L)
    tl = max(LANES, (tl // LANES) * LANES)
    n_tiles = pl.cdiv(L, tl)                        # ragged last block is OK
    n_elems = SUBLANES * L

    return pl.pallas_call(
        _mlp_kernel,
        out_shape=jax.ShapeDtypeStruct((SUBLANES, L), jnp.float32),
        grid=(n_tiles,),
        in_specs=[
            pl.BlockSpec((2, SUBLANES, tl), lambda i: (0, 0, i)),  # x tile (VMEM)
            pl.BlockSpec(memory_space=pltpu.SMEM),                 # w1 (10,)
            pl.BlockSpec(memory_space=pltpu.SMEM),                 # b1 (5,)
            pl.BlockSpec(memory_space=pltpu.SMEM),                 # w2 (5,)
            pl.BlockSpec(memory_space=pltpu.SMEM),                 # b2 (1,)
        ],
        out_specs=pl.BlockSpec((SUBLANES, tl), lambda i: (0, i)),
        compiler_params=pltpu.CompilerParams(
            dimension_semantics=("parallel",)),     # megacore-shard the batch axis
        cost_estimate=pl.CostEstimate(
            flops=44 * n_elems,
            transcendentals=6 * n_elems,
            bytes_accessed=12 * n_elems),
    )(x_slab, w1, b1, w2, b2)


def modelp_forward(x, w1, b1, w2, b2, *, max_tile_lanes=32768):
    """Module-shaped wrapper: x (B, 2) f32 -> (B, 1) f32.

    Intended to be jax.jit'ed so the pad+transpose+reshape fuse into a single
    copy; producers that can supply feature-major data should call
    modelp_forward_slab directly and skip this plumbing entirely.
    """
    B = x.shape[0]
    # Pad only to the vreg granularity (8*128 = 1024) -- decoupled from tl.
    B_pad = _round_up(max(B, 1), SUBLANES * LANES)
    L = B_pad // SUBLANES

    x_slab = jnp.pad(x, ((0, B_pad - B), (0, 0))).T.reshape(2, SUBLANES, L)
    out = modelp_forward_slab(x_slab, w1, b1, w2, b2,
                              max_tile_lanes=max_tile_lanes)
    return out.reshape(B_pad, 1)[:B]


def init_params(key):
    """Deterministic init mimicking torch.nn.Linear (uniform +-1/sqrt(fan_in)),
    stored in the flat layout the kernel consumes."""
    k1, k2, k3, k4 = jax.random.split(key, 4)
    bound1 = 1.0 / jnp.sqrt(2.0)
    w1 = jax.random.uniform(k1, (10,), jnp.float32, -bound1, bound1)  # W1[j,k] @ 2*j+k
    b1 = jax.random.uniform(k2, (5,), jnp.float32, -bound1, bound1)
    bound2 = 1.0 / jnp.sqrt(5.0)
    w2 = jax.random.uniform(k3, (5,), jnp.float32, -bound2, bound2)   # W2[0,j]
    b2 = jax.random.uniform(k4, (1,), jnp.float32, -bound2, bound2)
    return w1, b1, w2, b2


def reference_forward(x, w1, b1, w2, b2):
    """Pure elementwise f32 reference (no MXU / default-precision matmuls),
    mathematically identical to the torch module."""
    W1 = w1.reshape(5, 2)                            # torch layout (out, in)
    h = (x[:, 0:1] * W1[:, 0][None, :]
         + x[:, 1:2] * W1[:, 1][None, :]
         + b1[None, :])                              # (B, 5)
    h = jnp.where(h > 0, h, jnp.expm1(h))            # ELU(alpha=1)
    y = jnp.sum(h * w2[None, :], axis=-1, keepdims=True) + b2   # (B, 1)
    return jax.nn.sigmoid(y)


if __name__ == "__main__":
    key = jax.random.PRNGKey(0)
    kx, kp = jax.random.split(key)
    w1, b1, w2, b2 = init_params(kp)

    fwd = jax.jit(modelp_forward)

    # Small shape (B=8): single grid step, exercises padding to one vreg slab.
    B = 8
    x_small = jax.random.normal(kx, (B, 2), dtype=jnp.float32)
    out_small = jax.block_until_ready(fwd(x_small, w1, b1, w2, b2))
    ref_small = reference_forward(x_small, w1, b1, w2, b2)
    assert out_small.shape == (B, 1)
    assert jnp.allclose(out_small, ref_small, atol=1e-3, rtol=1e-3)

    # Multi-tile checks: B=2500 pads to 3072 -> L=384 lanes.
    B2 = 2500
    x_big = jax.random.normal(kx, (B2, 2), dtype=jnp.float32)
    ref_big = reference_forward(x_big, w1, b1, w2, b2)

    # (a) three exact 128-lane tiles (exercises index_map + parallel grid axis)
    fwd_128 = jax.jit(functools.partial(modelp_forward, max_tile_lanes=128))
    out_a = jax.block_until_ready(fwd_128(x_big, w1, b1, w2, b2))
    assert out_a.shape == (B2, 1)
    assert jnp.allclose(out_a, ref_big, atol=1e-3, rtol=1e-3)

    # (b) ragged last block: tl=256 over L=384 -> grid=cdiv(384,256)=2
    #     (exercises the decoupled padding / cdiv grid from the perf review)
    fwd_256 = jax.jit(functools.partial(modelp_forward, max_tile_lanes=256))
    out_b = jax.block_until_ready(fwd_256(x_big, w1, b1, w2, b2))
    assert out_b.shape == (B2, 1)
    assert jnp.allclose(out_b, ref_big, atol=1e-3, rtol=1e-3)

    print("KERNEL_OK")
</pallas_src>

<mosaic_0001>
module attributes {stable_mosaic.version = 11 : i64} {
  func.func @_mlp_kernel(%arg0: i32, %arg1: memref<2x8x128xf32, #tpu.memory_space<vmem>>, %arg2: memref<10xf32, #tpu.memory_space<smem>>, %arg3: memref<5xf32, #tpu.memory_space<smem>>, %arg4: memref<5xf32, #tpu.memory_space<smem>>, %arg5: memref<1xf32, #tpu.memory_space<smem>>, %arg6: memref<8x128xf32, #tpu.memory_space<vmem>>) attributes {dimension_semantics = [#tpu.dimension_semantics<parallel>], iteration_bounds = array<i64: 1>, scalar_prefetch = 0 : i64, scratch_operands = 0 : i64, tpu.core_type = #tpu.core_type<tc>, window_params = [{transform_indices = @transform_0, window_bounds = array<i64: 2, 8, 128>}, {transform_indices = @transform_1, window_bounds = array<i64: 10>}, {transform_indices = @transform_2, window_bounds = array<i64: 5>}, {transform_indices = @transform_3, window_bounds = array<i64: 5>}, {transform_indices = @transform_4, window_bounds = array<i64: 1>}, {transform_indices = @transform_5, window_bounds = array<i64: 8, 128>}]} {
    %c0 = arith.constant 0 : index
    %c0_0 = arith.constant 0 : index
    %c0_1 = arith.constant 0 : index
    %0 = vector.load %arg1[%c0, %c0_0, %c0_1] : memref<2x8x128xf32, #tpu.memory_space<vmem>>, vector<1x8x128xf32>
    %1 = vector.shape_cast %0 : vector<1x8x128xf32> to vector<8x128xf32>
    %c1 = arith.constant 1 : index
    %c0_2 = arith.constant 0 : index
    %c0_3 = arith.constant 0 : index
    %2 = vector.load %arg1[%c1, %c0_2, %c0_3] : memref<2x8x128xf32, #tpu.memory_space<vmem>>, vector<1x8x128xf32>
    %3 = vector.shape_cast %2 : vector<1x8x128xf32> to vector<8x128xf32>
    %c0_4 = arith.constant 0 : index
    %4 = memref.load %arg2[%c0_4] : memref<10xf32, #tpu.memory_space<smem>>
    %5 = vector.broadcast %4 : f32 to vector<8x128xf32>
    %6 = arith.mulf %5, %1 : vector<8x128xf32>
    %c1_5 = arith.constant 1 : index
    %7 = memref.load %arg2[%c1_5] : memref<10xf32, #tpu.memory_space<smem>>
    %8 = vector.broadcast %7 : f32 to vector<8x128xf32>
    %9 = arith.mulf %8, %3 : vector<8x128xf32>
    %10 = arith.addf %6, %9 : vector<8x128xf32>
    %c0_6 = arith.constant 0 : index
    %11 = memref.load %arg3[%c0_6] : memref<5xf32, #tpu.memory_space<smem>>
    %12 = vector.broadcast %11 : f32 to vector<8x128xf32>
    %13 = arith.addf %10, %12 : vector<8x128xf32>
    %cst = arith.constant 0.000000e+00 : f32
    %14 = vector.broadcast %cst : f32 to vector<8x128xf32>
    %15 = arith.cmpf ogt, %13, %14 : vector<8x128xf32>
    %16 = math.exp %13 : vector<8x128xf32>
    %cst_7 = arith.constant 1.000000e+00 : f32
    %17 = vector.broadcast %cst_7 : f32 to vector<8x128xf32>
    %18 = arith.subf %16, %17 : vector<8x128xf32>
    %19 = arith.select %15, %13, %18 : vector<8x128xi1>, vector<8x128xf32>
    %c0_8 = arith.constant 0 : index
    %20 = memref.load %arg4[%c0_8] : memref<5xf32, #tpu.memory_space<smem>>
    %21 = vector.broadcast %20 : f32 to vector<8x128xf32>
    %22 = arith.mulf %21, %19 : vector<8x128xf32>
    %c2 = arith.constant 2 : index
    %23 = memref.load %arg2[%c2] : memref<10xf32, #tpu.memory_space<smem>>
    %24 = vector.broadcast %23 : f32 to vector<8x128xf32>
    %25 = arith.mulf %24, %1 : vector<8x128xf32>
    %c3 = arith.constant 3 : index
    %26 = memref.load %arg2[%c3] : memref<10xf32, #tpu.memory_space<smem>>
    %27 = vector.broadcast %26 : f32 to vector<8x128xf32>
    %28 = arith.mulf %27, %3 : vector<8x128xf32>
    %29 = arith.addf %25, %28 : vector<8x128xf32>
    %c1_9 = arith.constant 1 : index
    %30 = memref.load %arg3[%c1_9] : memref<5xf32, #tpu.memory_space<smem>>
    %31 = vector.broadcast %30 : f32 to vector<8x128xf32>
    %32 = arith.addf %29, %31 : vector<8x128xf32>
    %cst_10 = arith.constant 0.000000e+00 : f32
    %33 = vector.broadcast %cst_10 : f32 to vector<8x128xf32>
    %34 = arith.cmpf ogt, %32, %33 : vector<8x128xf32>
    %35 = math.exp %32 : vector<8x128xf32>
    %cst_11 = arith.constant 1.000000e+00 : f32
    %36 = vector.broadcast %cst_11 : f32 to vector<8x128xf32>
    %37 = arith.subf %35, %36 : vector<8x128xf32>
    %38 = arith.select %34, %32, %37 : vector<8x128xi1>, vector<8x128xf32>
    %c1_12 = arith.constant 1 : index
    %39 = memref.load %arg4[%c1_12] : memref<5xf32, #tpu.memory_space<smem>>
    %40 = vector.broadcast %39 : f32 to vector<8x128xf32>
    %41 = arith.mulf %40, %38 : vector<8x128xf32>
    %42 = arith.addf %22, %41 : vector<8x128xf32>
    %c4 = arith.constant 4 : index
    %43 = memref.load %arg2[%c4] : memref<10xf32, #tpu.memory_space<smem>>
    %44 = vector.broadcast %43 : f32 to vector<8x128xf32>
    %45 = arith.mulf %44, %1 : vector<8x128xf32>
    %c5 = arith.constant 5 : index
    %46 = memref.load %arg2[%c5] : memref<10xf32, #tpu.memory_space<smem>>
    %47 = vector.broadcast %46 : f32 to vector<8x128xf32>
    %48 = arith.mulf %47, %3 : vector<8x128xf32>
    %49 = arith.addf %45, %48 : vector<8x128xf32>
    %c2_13 = arith.constant 2 : index
    %50 = memref.load %arg3[%c2_13] : memref<5xf32, #tpu.memory_space<smem>>
    %51 = vector.broadcast %50 : f32 to vector<8x128xf32>
    %52 = arith.addf %49, %51 : vector<8x128xf32>
    %cst_14 = arith.constant 0.000000e+00 : f32
    %53 = vector.broadcast %cst_14 : f32 to vector<8x128xf32>
    %54 = arith.cmpf ogt, %52, %53 : vector<8x128xf32>
    %55 = math.exp %52 : vector<8x128xf32>
    %cst_15 = arith.constant 1.000000e+00 : f32
    %56 = vector.broadcast %cst_15 : f32 to vector<8x128xf32>
    %57 = arith.subf %55, %56 : vector<8x128xf32>
    %58 = arith.select %54, %52, %57 : vector<8x128xi1>, vector<8x128xf32>
    %c2_16 = arith.constant 2 : index
    %59 = memref.load %arg4[%c2_16] : memref<5xf32, #tpu.memory_space<smem>>
    %60 = vector.broadcast %59 : f32 to vector<8x128xf32>
    %61 = arith.mulf %60, %58 : vector<8x128xf32>
    %62 = arith.addf %42, %61 : vector<8x128xf32>
    %c6 = arith.constant 6 : index
    %63 = memref.load %arg2[%c6] : memref<10xf32, #tpu.memory_space<smem>>
    %64 = vector.broadcast %63 : f32 to vector<8x128xf32>
    %65 = arith.mulf %64, %1 : vector<8x128xf32>
    %c7 = arith.constant 7 : index
    %66 = memref.load %arg2[%c7] : memref<10xf32, #tpu.memory_space<smem>>
    %67 = vector.broadcast %66 : f32 to vector<8x128xf32>
    %68 = arith.mulf %67, %3 : vector<8x128xf32>
    %69 = arith.addf %65, %68 : vector<8x128xf32>
    %c3_17 = arith.constant 3 : index
    %70 = memref.load %arg3[%c3_17] : memref<5xf32, #tpu.memory_space<smem>>
    %71 = vector.broadcast %70 : f32 to vector<8x128xf32>
    %72 = arith.addf %69, %71 : vector<8x128xf32>
    %cst_18 = arith.constant 0.000000e+00 : f32
    %73 = vector.broadcast %cst_18 : f32 to vector<8x128xf32>
    %74 = arith.cmpf ogt, %72, %73 : vector<8x128xf32>
    %75 = math.exp %72 : vector<8x128xf32>
    %cst_19 = arith.constant 1.000000e+00 : f32
    %76 = vector.broadcast %cst_19 : f32 to vector<8x128xf32>
    %77 = arith.subf %75, %76 : vector<8x128xf32>
    %78 = arith.select %74, %72, %77 : vector<8x128xi1>, vector<8x128xf32>
    %c3_20 = arith.constant 3 : index
    %79 = memref.load %arg4[%c3_20] : memref<5xf32, #tpu.memory_space<smem>>
    %80 = vector.broadcast %79 : f32 to vector<8x128xf32>
    %81 = arith.mulf %80, %78 : vector<8x128xf32>
    %82 = arith.addf %62, %81 : vector<8x128xf32>
    %c8 = arith.constant 8 : index
    %83 = memref.load %arg2[%c8] : memref<10xf32, #tpu.memory_space<smem>>
    %84 = vector.broadcast %83 : f32 to vector<8x128xf32>
    %85 = arith.mulf %84, %1 : vector<8x128xf32>
    %c9 = arith.constant 9 : index
    %86 = memref.load %arg2[%c9] : memref<10xf32, #tpu.memory_space<smem>>
    %87 = vector.broadcast %86 : f32 to vector<8x128xf32>
    %88 = arith.mulf %87, %3 : vector<8x128xf32>
    %89 = arith.addf %85, %88 : vector<8x128xf32>
    %c4_21 = arith.constant 4 : index
    %90 = memref.load %arg3[%c4_21] : memref<5xf32, #tpu.memory_space<smem>>
    %91 = vector.broadcast %90 : f32 to vector<8x128xf32>
    %92 = arith.addf %89, %91 : vector<8x128xf32>
    %cst_22 = arith.constant 0.000000e+00 : f32
    %93 = vector.broadcast %cst_22 : f32 to vector<8x128xf32>
    %94 = arith.cmpf ogt, %92, %93 : vector<8x128xf32>
    %95 = math.exp %92 : vector<8x128xf32>
    %cst_23 = arith.constant 1.000000e+00 : f32
    %96 = vector.broadcast %cst_23 : f32 to vector<8x128xf32>
    %97 = arith.subf %95, %96 : vector<8x128xf32>
    %98 = arith.select %94, %92, %97 : vector<8x128xi1>, vector<8x128xf32>
    %c4_24 = arith.constant 4 : index
    %99 = memref.load %arg4[%c4_24] : memref<5xf32, #tpu.memory_space<smem>>
    %100 = vector.broadcast %99 : f32 to vector<8x128xf32>
    %101 = arith.mulf %100, %98 : vector<8x128xf32>
    %102 = arith.addf %82, %101 : vector<8x128xf32>
    %c0_25 = arith.constant 0 : index
    %103 = memref.load %arg5[%c0_25] : memref<1xf32, #tpu.memory_space<smem>>
    %104 = vector.broadcast %103 : f32 to vector<8x128xf32>
    %105 = arith.addf %102, %104 : vector<8x128xf32>
    %cst_26 = arith.constant 5.000000e-01 : f32
    %106 = vector.broadcast %cst_26 : f32 to vector<8x128xf32>
    %107 = arith.mulf %106, %105 : vector<8x128xf32>
    %108 = math.tanh %107 : vector<8x128xf32>
    %cst_27 = arith.constant 5.000000e-01 : f32
    %109 = vector.broadcast %cst_27 : f32 to vector<8x128xf32>
    %110 = arith.mulf %109, %108 : vector<8x128xf32>
    %cst_28 = arith.constant 5.000000e-01 : f32
    %111 = vector.broadcast %cst_28 : f32 to vector<8x128xf32>
    %112 = arith.addf %110, %111 : vector<8x128xf32>
    %c0_29 = arith.constant 0 : index
    %c0_30 = arith.constant 0 : index
    %113 = vector.load %arg6[%c0_29, %c0_30] : memref<8x128xf32, #tpu.memory_space<vmem>>, vector<8x128xf32>
    tpu.vector_store %arg6[%c0_29, %c0_30], %112 {strides = array<i32>} : memref<8x128xf32, #tpu.memory_space<vmem>>, vector<8x128xf32>,
    return
  }
  func.func @transform_0(%arg0: i32) -> (i32, i32, i32) {
    %c0_i32 = arith.constant 0 : i32
    %c0_i32_0 = arith.constant 0 : i32
    %c0_i32_1 = arith.constant 0 : i32
    return %c0_i32, %c0_i32_0, %arg0 : i32, i32, i32
  }
  func.func @transform_1(%arg0: i32) -> i32 {
    %c0_i32 = arith.constant 0 : i32
    %c0_i32_0 = arith.constant 0 : i32
    return %c0_i32 : i32
  }
  func.func @transform_2(%arg0: i32) -> i32 {
    %c0_i32 = arith.constant 0 : i32
    %c0_i32_0 = arith.constant 0 : i32
    return %c0_i32 : i32
  }
  func.func @transform_3(%arg0: i32) -> i32 {
    %c0_i32 = arith.constant 0 : i32
    %c0_i32_0 = arith.constant 0 : i32
    return %c0_i32 : i32
  }
  func.func @transform_4(%arg0: i32) -> i32 {
    %c0_i32 = arith.constant 0 : i32
    %c0_i32_0 = arith.constant 0 : i32
    return %c0_i32 : i32
  }
  func.func @transform_5(%arg0: i32) -> (i32, i32) {
    %c0_i32 = arith.constant 0 : i32
    %c0_i32_0 = arith.constant 0 : i32
    return %c0_i32, %arg0 : i32, i32
  }
}

</mosaic_0001>

<bundles_post_ra>
// kernel: modelp_forward.1
= control target key start
LH: loop header
LB: loop body
LE: loop exit
PB: predicated region body
PF: predicated region fallthrough
CT: control target
= control target key end

     0   :  { %11 = vsyncpa [#allocation4], 0  ;;  %s315_s0 = inlined_call_operand.vmem [shape: f32[2,8,128], index: 0, kind: input, shape index: {}]   ;;  %s316_s1 = inlined_call_operand.vmem [shape: f32[10], index: 1, kind: input, shape index: {}]   ;;  %s317_s2 = inlined_call_operand.vmem [shape: f32[5], index: 2, kind: input, shape index: {}]   ;;  %s318_s3 = inlined_call_operand.vmem [shape: f32[5], index: 3, kind: input, shape index: {}]   ;;  %s319_s4 = inlined_call_operand.<no memory space> [shape: f32[1], index: 4, kind: input, shape index: {}]   ;;  %s320_s5 = inlined_call_operand.vmem [shape: f32[8,128], index: 5, kind: output, shape index: {}]  }
   0x1   :  { %12 = vsyncpa [#allocation6], 0  ;;  %s29_s20 = sshll.u32 %s317_s2, 4  ;;  %s20_s23 = sshll.u32 %s316_s1, 4  ;;  %s30_s20 = int_to_ptr.vmem [resolvable:$true] %s29_s20  ;;  %s21_s23 = int_to_ptr.vmem [resolvable:$true] %s20_s23 }
   0x2   :  { %s246_s24 = smov [#allocation5]   ;;  %s247_s25 = smov [#allocation3]  }
   0x3   :  { %32 = dma.vmem_to_smem %s30_s20, 16, %s246_s24, [#allocation6]  }
   0x4   :  { %23 = dma.vmem_to_smem %s21_s23, 16, %s247_s25, [#allocation4]  }
   0x5   :  { %s38_s28 = sshll.u32 %s318_s3, 4  ;;  %s248_s29 = smov [#allocation7]   ;;  %s39_s28 = int_to_ptr.vmem [resolvable:$true] %s38_s28 }
   0x6   :  { %41 = dma.vmem_to_smem %s39_s28, 16, %s248_s29, [#allocation6]  }
   0x7   :  { %242 = dma.done.wait [#allocation4], 16  }
   0x8   :  { %243 = vsyncadd [#allocation4], 4294967280 }
   0x9   :  { %244 = dma.done.wait [#allocation6], 32  }
   0xa   :  { %245 = vsyncadd [#allocation6], 4294967264 }
   0xb   :  { %56 = sfence }
   0xc   :  { %s60_s2 = sld [smem:[#allocation3]]  ;;  %v57_v0 = vld [vmem:[%s315_s0] sm:$0xff]  ;;  %v168_v1 = vld [vmem:[%s315_s0 + $0x8] sm:$0xff] }
   0xd   :  { %s169_s30 = sld [smem:[#allocation3 + $0x1]] }
   0xe   :  { %s67_s1 = sld [smem:[#allocation5]] }
   0xf   :  { %s171_s8 = sld [smem:[#allocation3 + $0x2]] }
  0x10   :  { %s172_s3 = sld [smem:[#allocation3 + $0x3]] }
  0x11   :  { %s173_s11 = sld [smem:[#allocation5 + $0x1]] }
  0x12   :  { %v61_v2 = vstv %s60_s2  ;;  %s176_s12 = sld [smem:[#allocation3 + $0x4]] }
  0x13   :  { %v62_v3 = vmul.f32 %v61_v2, %v57_v0  ;;  %v64_v4 = vstv %s169_s30  ;;  %s177_s13 = sld [smem:[#allocation3 + $0x5]] }
  0x14   :  { %v65_v5 = vmul.f32 %v168_v1, %v64_v4  ;;  %v68_v6 = vstv %s67_s1  ;;  %s178_s14 = sld [smem:[#allocation5 + $0x2]] }
  0x15   :  { %v79_v8 = vstv %s171_s8  ;;  %s181_s15 = sld [smem:[#allocation3 + $0x6]] }
  0x16   :  { %v66_v7 = vadd.f32 %v65_v5, %v62_v3  ;;  %v80_v9 = vmul.f32 %v79_v8, %v57_v0  ;;  %v82_v10 = vstv %s172_s3  ;;  %s182_s16 = sld [smem:[#allocation3 + $0x7]] }
  0x17   :  { %v83_v12 = vmul.f32 %v168_v1, %v82_v10  ;;  %v86_v13 = vstv %s173_s11  ;;  %s294_s0 = sld [smem:[#allocation5 + $0x3]] }
  0x18   :  { %v69_v11 = vadd.f32 %v68_v6, %v66_v7  ;;  %v98_v16 = vstv %s176_s12  ;;  %s296_s17 = sld [smem:[#allocation7]]  ;;  %v155_v6 = vstv %s319_s4 }
  0x19   :  { %v84_v15 = vadd.f32 %v83_v12, %v80_v9  ;;  %v99_v17 = vmul.f32 %v98_v16, %v57_v0  ;;  %v101_v18 = vstv %s177_s13  ;;  %s186_s18 = sld [smem:[#allocation3 + $0x8]] }
  0x1a   :  { %v71_v14 = vmul.f32 1.442695, %v69_v11  ;;  %v102_v20 = vmul.f32 %v168_v1, %v101_v18  ;;  %v105_v21 = vstv %s178_s14  ;;  %s187_s19 = sld [smem:[#allocation3 + $0x9]]  ;;  %vm70_vm0 = vcmp.gt.f32.partialorder %v69_v11, 0.0 }
  0x1b   :  { %v87_v19 = vadd.f32 %v86_v13, %v84_v15  ;;  %v117_v24 = vstv %s181_s15  ;;  %s298_s20 = sld [smem:[#allocation5 + $0x4]] }
  0x1c   :  { %194 = vpow2.f32 %v71_v14  ;;  %v103_v23 = vadd.f32 %v102_v20, %v99_v17  ;;  %s300_s21 = sld [smem:[#allocation7 + $0x1]]  ;;  %v118_v25 = vmul.f32 %v117_v24, %v57_v0  ;;  %v120_v26 = vstv %s182_s16 }
  0x1d   :  { %v89_v22 = vmul.f32 1.442695, %v87_v19  ;;  %v121_v28 = vmul.f32 %v168_v1, %v120_v26  ;;  %v124_v29 = vstv %s294_s0  ;;  %s303_s22 = sld [smem:[#allocation7 + $0x2]]  ;;  %vm88_vm1 = vcmp.gt.f32.partialorder %v87_v19, 0.0 }
  0x1e   :  { %v106_v27 = vadd.f32 %v105_v21, %v103_v23  ;;  %v76_v40 = vstv %s296_s17  ;;  %s185_s23 = sld [smem:[#allocation7 + $0x3]] }
  0x1f   :  { %196 = vpow2.f32 %v89_v22  ;;  %v122_v32 = vadd.f32 %v121_v28, %v118_v25  ;;  %v136_v33 = vstv %s186_s18  ;;  %s190_s24 = sld [smem:[#allocation7 + $0x4]] }
  0x20   :  { %v108_v31 = vmul.f32 1.442695, %v106_v27  ;;  %v137_v35 = vmul.f32 %v136_v33, %v57_v0  ;;  %v139_v36 = vstv %s187_s19  ;;  %vm107_vm2 = vcmp.gt.f32.partialorder %v106_v27, 0.0 }
  0x21   :  { %v125_v37 = vadd.f32 %v124_v29, %v122_v32  ;;  %v140_v38 = vmul.f32 %v168_v1, %v139_v36  ;;  %v143_v41 = vstv %s298_s20 }
  0x22   :  { %v195_v30 = vpop.eup %194  ;;  %198 = vpow2.f32 %v108_v31  ;;  %v94_v46 = vstv %s300_s21 }
  0x23   :  { %v170_v34 = vadd.f32 -1.0, %v195_v30  ;;  %v127_v43 = vmul.f32 1.442695, %v125_v37  ;;  %v141_v44 = vadd.f32 %v140_v38, %v137_v35  ;;  %v113_v54 = vstv %s303_s22 }
  0x24   :  { %vm126_vm3 = vcmp.gt.f32.partialorder %v125_v37, 0.0  ;;  %v132_v60 = vstv %s185_s23 }
  0x25   :  { %v74_v39 = vsel %vm70_vm0, %v69_v11, %v170_v34  ;;  %v197_v42 = vpop.eup %196  ;;  %200 = vpow2.f32 %v127_v43  ;;  %v144_v48 = vadd.f32 %v143_v41, %v141_v44  ;;  %v151_v2 = vstv %s190_s24 }
  0x26   :  { %v174_v45 = vadd.f32 -1.0, %v197_v42  ;;  %v77_v47 = vmul.f32 %v76_v40, %v74_v39 }
  0x27   :  { %v146_v52 = vmul.f32 1.442695, %v144_v48  ;;  %vm145_vm4 = vcmp.gt.f32.partialorder %v144_v48, 0.0 }
  0x28   :  { %v92_v49 = vsel %vm88_vm1, %v87_v19, %v174_v45  ;;  %v199_v50 = vpop.eup %198 }
  0x29   :  { %v95_v51 = vmul.f32 %v94_v46, %v92_v49  ;;  %v179_v53 = vadd.f32 -1.0, %v199_v50  ;;  %202 = vpow2.f32 %v146_v52 }
  0x2b   :  { %v96_v55 = vadd.f32 %v95_v51, %v77_v47  ;;  %v111_v56 = vsel %vm107_vm2, %v106_v27, %v179_v53  ;;  %v201_v57 = vpop.eup %200 }
  0x2c   :  { %v114_v58 = vmul.f32 %v113_v54, %v111_v56  ;;  %v184_v59 = vadd.f32 -1.0, %v201_v57 }
  0x2e   :  { %v115_v61 = vadd.f32 %v114_v58, %v96_v55  ;;  %v130_v62 = vsel %vm126_vm3, %v125_v37, %v184_v59 }
  0x2f   :  { %v203_v63 = vpop.eup %202  ;;  %v133_v0 = vmul.f32 %v132_v60, %v130_v62 }
  0x30   :  { %v189_v1 = vadd.f32 -1.0, %v203_v63 }
  0x31   :  { %v134_v3 = vadd.f32 %v133_v0, %v115_v61 }
  0x32   :  { %v149_v4 = vsel %vm145_vm4, %v144_v48, %v189_v1 }
  0x33   :  { %v152_v5 = vmul.f32 %v151_v2, %v149_v4 }
  0x35   :  { %v153_v7 = vadd.f32 %v152_v5, %v134_v3 }
  0x37   :  { %v156_v8 = vadd.f32 %v155_v6, %v153_v7 }
  0x39   :  { %v157_v9 = vmul.f32 0.5, %v156_v8 }
  0x3b   :  { %204 = vtanh.f32 %v157_v9 }
  0x41   :  { %v205_v10 = vpop.eup %204 }
  0x42   :  { %v159_v11 = vmul.f32 0.5, %v205_v10 }
  0x44   :  { %v160_v12 = vadd.f32 0.5, %v159_v11 }
  0x46   :  { %161 = vst [vmem:[%s320_s5] sm:$0xff] %v160_v12 }
  0x47   :  { %166 = vsyncpa [#allocation4], 1 }
  0x48   :  { %167 = vsyncpa [#allocation6], 1 }

</bundles_post_ra>
